<compile_context>
chip_gen: v7x
topology: tpu7x:2x2x1
jax: 0.10.0
libtpu: 0.0.40
codegen_flags: <defaults>
</compile_context>

<pallas_src>
import functools

import jax
import jax.numpy as jnp
from jax.experimental import pallas as pl
from jax.experimental.pallas import tpu as pltpu

LANE = 128
_EPS = 1e-5


def _round_up(x, m):
    return ((x + m - 1) // m) * m


@functools.lru_cache(maxsize=None)
def _budgets():
    """Generation-aware VMEM / tile budgets (falls back to v7x-safe numbers)."""
    vmem = None
    try:
        vmem = int(pltpu.get_tpu_info().vmem_capacity_bytes)
    except Exception:
        vmem = None
    if vmem is not None and vmem >= 100 * 1024 * 1024:
        # v5e / v6e: 128 MiB VMEM -> bigger tiles, fewer grid steps, larger fused problems.
        return {"vmem_limit": 96 * 1024 * 1024,
                "weight_cap": 16 * 1024 * 1024,
                "fuse_bytes": 48 * 1024 * 1024}
    # v7x (64 MiB physical VMEM) or unknown: conservative.
    return {"vmem_limit": 48 * 1024 * 1024,
            "weight_cap": 8 * 1024 * 1024,
            "fuse_bytes": 24 * 1024 * 1024}


# --------------------------------------------------------------------------- kernels
def _bn_relu(y, g, b, *, apply_bn, affine, apply_relu, eps, inv_n, row_mask):
    """Epilogue on an f32 (N_pad, TN) tile: training-mode BatchNorm1d (+affine) + ReLU.

    Padded batch rows (row_mask False) are excluded from the statistics and forced back
    to zero on output so the next layer's matmul/stats stay exact.
    """
    if apply_bn:
        if row_mask is not None:
            y = jnp.where(row_mask, y, 0.0)           # padded rows contribute 0 to sums
        mean = jnp.sum(y, axis=0, keepdims=True) * inv_n
        centered = y - mean
        c_var = jnp.where(row_mask, centered, 0.0) if row_mask is not None else centered
        var = jnp.sum(c_var * c_var, axis=0, keepdims=True) * inv_n   # two-pass variance
        y = centered * jax.lax.rsqrt(var + eps)
        if affine:
            y = y * g.astype(jnp.float32) + b.astype(jnp.float32)
    if apply_relu:
        y = jnp.maximum(y, 0.0)
    if row_mask is not None:
        y = jnp.where(row_mask, y, 0.0)               # keep padded rows exactly zero
    return y


def _layer_kernel(*refs, apply_bn, affine, apply_relu, eps, actual_n):
    """One MLP layer, tiled over output features.

    refs: (x_ref, w_ref[, g_ref, b_ref], o_ref)
      x_ref: (N_pad, D1)  full (padded) batch, padded input features  -- grid-invariant
      w_ref: (D1, TN)     pre-transposed weight tile (in, out) -> plain x @ W on the MXU
      g/b  : (1, TN)
      o_ref: (N_pad, TN)
    """
    if apply_bn and affine:
        x_ref, w_ref, g_ref, b_ref, o_ref = refs
        g, b = g_ref[...], b_ref[...]
    else:
        x_ref, w_ref, o_ref = refs
        g = b = None

    y = jnp.dot(x_ref[...], w_ref[...], preferred_element_type=jnp.float32)  # (N_pad, TN) f32

    n_pad = y.shape[0]
    row_mask = None
    if n_pad != actual_n:
        row_mask = jax.lax.broadcasted_iota(jnp.int32, (n_pad, 1), 0) < actual_n

    y = _bn_relu(y, g, b, apply_bn=apply_bn, affine=affine, apply_relu=apply_relu,
                 eps=eps, inv_n=1.0 / actual_n, row_mask=row_mask)
    o_ref[...] = y.astype(o_ref.dtype)


def _mlp_kernel(*refs, layer_cfg, eps, actual_n):
    """Whole MLP fused into one kernel (small problems: everything resident in VMEM).

    refs: x_ref, then per layer (w_ref[, g_ref, b_ref]), then o_ref.
    """
    # TODO(synk): for mid-size fused problems, pipeline the big hidden layers' weight tiles
    # with pltpu.emit_pipeline to overlap weight DMA with the previous layer's matmul.
    x_ref, o_ref = refs[0], refs[-1]
    idx = 1
    h = x_ref[...]
    n_pad = h.shape[0]
    row_mask = None
    if n_pad != actual_n:
        row_mask = jax.lax.broadcasted_iota(jnp.int32, (n_pad, 1), 0) < actual_n

    for cfg in layer_cfg:
        w_ref = refs[idx]
        idx += 1
        y = jnp.dot(h.astype(w_ref.dtype), w_ref[...], preferred_element_type=jnp.float32)
        if cfg["bn"] and cfg["affine"]:
            g, b = refs[idx][...], refs[idx + 1][...]
            idx += 2
        else:
            g = b = None
        h = _bn_relu(y, g, b, apply_bn=cfg["bn"], affine=cfg["affine"],
                     apply_relu=cfg["relu"], eps=eps, inv_n=1.0 / actual_n,
                     row_mask=row_mask)
    o_ref[...] = h.astype(o_ref.dtype)


# --------------------------------------------------------------------------- wrappers
def _pick_tn(d1, d2, itemsize, cap_bytes):
    """Largest lane-multiple divisor of d2 whose (d1, tn) weight tile fits cap_bytes.
    Prefers >=2 grid steps (v7x megacore gets both TensorCores busy) as long as the
    tile stays >=256 wide (full MXU column width on v6e/v7x)."""
    n_lanes = d2 // LANE
    cands = sorted((LANE * k for k in range(1, n_lanes + 1) if n_lanes % k == 0),
                   reverse=True)
    fitting = [c for c in cands if d1 * c * itemsize <= cap_bytes] or [LANE]
    tn = fitting[0]
    if d2 // tn < 2:
        for c in fitting:
            if d2 // c >= 2 and c >= 2 * LANE:
                tn = c
                break
    return tn


def _layer_call(x, w, gamma, beta, *, apply_bn, affine, apply_relu, eps, actual_n):
    n_pad, d1 = x.shape
    d1w, d2 = w.shape
    assert d1 == d1w
    budgets = _budgets()
    tn = _pick_tn(d1, d2, w.dtype.itemsize, budgets["weight_cap"])
    grid = (d2 // tn,)

    kernel = functools.partial(_layer_kernel, apply_bn=apply_bn, affine=affine,
                               apply_relu=apply_relu, eps=eps, actual_n=actual_n)
    # TODO(synk): the (n_pad, d1) activation block is grid-invariant; single-buffering it
    # via pipeline_mode=pl.Buffered(1) would reclaim VMEM on v7x (kept default-buffered
    # here for maximum portability).
    in_specs = [
        pl.BlockSpec((n_pad, d1), lambda j: (0, 0)),   # activations: same block every step
        pl.BlockSpec((d1, tn), lambda j: (0, j)),      # weight: one output-feature tile
    ]
    args = [x, w]
    if apply_bn and affine:
        in_specs += [pl.BlockSpec((1, tn), lambda j: (0, j)),
                     pl.BlockSpec((1, tn), lambda j: (0, j))]
        args += [gamma, beta]

    return pl.pallas_call(
        kernel,
        out_shape=jax.ShapeDtypeStruct((n_pad, d2), w.dtype),
        grid=grid,
        in_specs=in_specs,
        out_specs=pl.BlockSpec((n_pad, tn), lambda j: (0, j)),
        compiler_params=pltpu.CompilerParams(
            dimension_semantics=("parallel",),          # megacore split on v7x
            vmem_limit_bytes=budgets["vmem_limit"]),
    )(*args)


def _fused_mlp_call(xp, prepared, *, last_bn, eps, actual_n):
    n_pad = xp.shape[0]
    num_layers = len(prepared)
    layer_cfg, args = [], [xp]
    for l, layer in enumerate(prepared):
        is_last = l == num_layers - 1
        cfg = {"bn": (not is_last) or last_bn, "affine": not is_last,
               "relu": not is_last}
        args.append(layer["w"])
        if cfg["bn"] and cfg["affine"]:
            args += [layer["gamma"], layer["beta"]]
        layer_cfg.append(cfg)

    d2 = prepared[-1]["w"].shape[1]
    kernel = functools.partial(_mlp_kernel, layer_cfg=tuple(layer_cfg), eps=eps,
                               actual_n=actual_n)
    return pl.pallas_call(
        kernel,
        out_shape=jax.ShapeDtypeStruct((n_pad, d2), prepared[-1]["w"].dtype),
        compiler_params=pltpu.CompilerParams(
            vmem_limit_bytes=_budgets()["vmem_limit"]),
    )(*args)


# --------------------------------------------------------------------------- params
def init_mlp_params(key, num_layers, dim, projection_size, hidden_size,
                    randomize_bn=False):
    """Synthetic init matching the nn.Module parameter shapes.
    Linear weights are PyTorch-layout (out_features, in_features)."""
    params = []
    for l in range(num_layers):
        dim1 = dim if l == 0 else hidden_size
        dim2 = projection_size if l == num_layers - 1 else hidden_size
        key, wk, gk, bk = jax.random.split(key, 4)
        bound = 1.0 / jnp.sqrt(dim1)
        layer = {"w": jax.random.uniform(wk, (dim2, dim1), jnp.float32, -bound, bound)}
        if l < num_layers - 1:
            if randomize_bn:   # exercise the affine path (PyTorch default init is 1/0)
                layer["gamma"] = jax.random.uniform(gk, (dim2,), jnp.float32, 0.5, 1.5)
                layer["beta"] = 0.1 * jax.random.normal(bk, (dim2,), jnp.float32)
            else:
                layer["gamma"] = jnp.ones((dim2,), jnp.float32)
                layer["beta"] = jnp.zeros((dim2,), jnp.float32)
        params.append(layer)
    return params


def prepare_params(params, dtype=jnp.bfloat16):
    """One-time layout plumbing:
      * cast weights (default bf16 -- the layers are weight-HBM-bound),
      * pad feature dims to 128-lane multiples,
      * pre-transpose weights to (in_p, out_p) so kernels do a plain x @ W (no per-tile
        transposed-RHS contraction).
    Gamma/beta stay f32 (used in the f32 epilogue)."""
    prepared = []
    for layer in params:
        w = layer["w"].astype(dtype)                  # (out, in) PyTorch layout
        out_d, in_d = w.shape
        out_p, in_p = _round_up(out_d, LANE), _round_up(in_d, LANE)
        w_t = jnp.pad(w.T, ((0, in_p - in_d), (0, out_p - out_d)))   # (in_p, out_p)
        entry = {"w": w_t, "out_dim": out_d, "in_dim": in_d}
        if "gamma" in layer:
            entry["gamma"] = jnp.pad(layer["gamma"].astype(jnp.float32),
                                     (0, out_p - out_d)).reshape(1, out_p)
            entry["beta"] = jnp.pad(layer["beta"].astype(jnp.float32),
                                    (0, out_p - out_d)).reshape(1, out_p)
        prepared.append(entry)
    return prepared


# --------------------------------------------------------------------------- forward
def mlp_forward(x, prepared, *, last_bn=True, eps=_EPS, force_per_layer=False):
    """Forward pass of the BYOL MLP. `prepared` comes from prepare_params.
    BatchNorm uses training-mode batch statistics over the TRUE batch size (padded rows
    are masked out inside the kernels)."""
    n, d_in = x.shape
    w_dtype = prepared[0]["w"].dtype
    in_p = prepared[0]["w"].shape[0]
    sub = max(8, 8 * (4 // jnp.dtype(w_dtype).itemsize))   # 8 sublanes f32, 16 bf16
    n_pad = _round_up(n, sub)

    xp = x
    if (n_pad != n) or (d_in != in_p):
        xp = jnp.pad(x, ((0, n_pad - n), (0, in_p - d_in)))
    xp = xp.astype(w_dtype)

    budgets = _budgets()
    footprint = xp.size * xp.dtype.itemsize
    for layer in prepared:
        w = layer["w"]
        footprint += w.size * w.dtype.itemsize + 8 * n_pad * w.shape[1]
        if "gamma" in layer:
            footprint += 8 * w.shape[1]

    if footprint <= budgets["fuse_bytes"] and not force_per_layer:
        out = _fused_mlp_call(xp, prepared, last_bn=last_bn, eps=eps, actual_n=n)
    else:
        # TODO(synk): very large batches (N*D1 block > VMEM) would need batch-tiled,
        # two-pass cross-tile BN statistics; not required for BYOL-sized problems.
        # TODO(synk): optional fp8 weight path (per-channel scale folded into the BN/affine
        # epilogue) would halve weight HBM traffic again on v7x.
        h = xp
        num_layers = len(prepared)
        for l, layer in enumerate(prepared):
            is_last = l == num_layers - 1
            h = _layer_call(
                h.astype(layer["w"].dtype), layer["w"],
                layer.get("gamma"), layer.get("beta"),
                apply_bn=(not is_last) or last_bn,
                affine=not is_last,
                apply_relu=not is_last,
                eps=eps, actual_n=n)
        out = h

    return out[:n, :prepared[-1]["out_dim"]].astype(x.dtype)


# --------------------------------------------------------------------------- reference
def _mlp_reference(x, params, *, last_bn=True, eps=_EPS):
    num_layers = len(params)
    h = x.astype(jnp.float32)
    for l, layer in enumerate(params):
        h = h @ layer["w"].T
        is_last = l == num_layers - 1
        if (not is_last) or last_bn:
            m = jnp.mean(h, axis=0, keepdims=True)
            v = jnp.mean((h - m) ** 2, axis=0, keepdims=True)
            h = (h - m) * jax.lax.rsqrt(v + eps)
            if not is_last:
                h = h * layer["gamma"][None, :] + layer["beta"][None, :]
                h = jnp.maximum(h, 0.0)
    return h


# --------------------------------------------------------------------------- main
if __name__ == "__main__":
    key = jax.random.PRNGKey(0)

    # ---- Config 1: tiny BYOL-style MLP -> whole-MLP fused kernel path (f32 checks).
    layers1, dim1, proj1, hidden1, batch1 = 2, 32, 16, 64, 8
    key, xk, pk = jax.random.split(key, 3)
    x1 = jax.random.normal(xk, (batch1, dim1), jnp.float32)
    params1 = init_mlp_params(pk, layers1, dim1, proj1, hidden1, randomize_bn=True)
    prep1_f32 = prepare_params(params1, dtype=jnp.float32)

    ref1 = _mlp_reference(x1, params1, last_bn=True)
    out1_fused = jax.block_until_ready(mlp_forward(x1, prep1_f32, last_bn=True))
    out1_tiled = jax.block_until_ready(
        mlp_forward(x1, prep1_f32, last_bn=True, force_per_layer=True))
    assert out1_fused.shape == (batch1, proj1)
    assert jnp.allclose(out1_fused, ref1, atol=5e-4, rtol=5e-4)
    assert jnp.allclose(out1_tiled, ref1, atol=5e-4, rtol=5e-4)

    # last_bn=False path (final layer is a plain Linear).
    ref1_nobn = _mlp_reference(x1, params1, last_bn=False)
    out1_nobn = jax.block_until_ready(mlp_forward(x1, prep1_f32, last_bn=False))
    assert jnp.allclose(out1_nobn, ref1_nobn, atol=5e-4, rtol=5e-4)

    # ---- Config 2: non-128-aligned feature dims, non-sublane-aligned batch (13),
    #      multi-layer per-layer path with feature tiling + batch padding/masking.
    layers2, dim2, proj2, hidden2, batch2 = 3, 200, 96, 640, 13
    key, xk, pk = jax.random.split(key, 3)
    x2 = jax.random.normal(xk, (batch2, dim2), jnp.float32)
    params2 = init_mlp_params(pk, layers2, dim2, proj2, hidden2, randomize_bn=True)
    prep2_f32 = prepare_params(params2, dtype=jnp.float32)

    ref2 = _mlp_reference(x2, params2, last_bn=True)
    out2_tiled = jax.block_until_ready(
        mlp_forward(x2, prep2_f32, last_bn=True, force_per_layer=True))
    out2_fused = jax.block_until_ready(mlp_forward(x2, prep2_f32, last_bn=True))
    assert out2_tiled.shape == (batch2, proj2)
    assert jnp.allclose(out2_tiled, ref2, atol=5e-4, rtol=5e-4)
    assert jnp.allclose(out2_fused, ref2, atol=5e-4, rtol=5e-4)

    # ---- Production default: bf16 weights/activations straight into the MXU.
    prep1_bf16 = prepare_params(params1)   # default dtype = bfloat16
    out1_bf16 = jax.block_until_ready(mlp_forward(x1, prep1_bf16, last_bn=True))
    assert out1_bf16.shape == (batch1, proj1)
    assert bool(jnp.all(jnp.isfinite(out1_bf16)))
    assert jnp.allclose(out1_bf16, ref1, atol=0.5, rtol=0.5)   # loose: bf16 quantization

    print("KERNEL_OK")
</pallas_src>

<mosaic_0001>
module attributes {stable_mosaic.version = 11 : i64} {
  func.func @_mlp_kernel(%arg0: memref<8x128xf32, #tpu.memory_space<vmem>>, %arg1: memref<128x128xf32, #tpu.memory_space<vmem>>, %arg2: memref<1x128xf32, #tpu.memory_space<vmem>>, %arg3: memref<1x128xf32, #tpu.memory_space<vmem>>, %arg4: memref<128x128xf32, #tpu.memory_space<vmem>>, %arg5: memref<8x128xf32, #tpu.memory_space<vmem>>) attributes {dimension_semantics = [], scalar_prefetch = 0 : i64, scratch_operands = 0 : i64, tpu.core_type = #tpu.core_type<tc>} {
    %c0 = arith.constant 0 : index
    %c0_0 = arith.constant 0 : index
    %0 = vector.load %arg0[%c0, %c0_0] : memref<8x128xf32, #tpu.memory_space<vmem>>, vector<8x128xf32>
    %c0_1 = arith.constant 0 : index
    %c0_2 = arith.constant 0 : index
    %1 = vector.load %arg1[%c0_1, %c0_2] : memref<128x128xf32, #tpu.memory_space<vmem>>, vector<128x128xf32>
    %cst = arith.constant dense<0.000000e+00> : vector<8x128xf32>
    %2 = tpu.matmul %0, %1, %cst {dimension_numbers = #tpu.dot_dimension_numbers<[1], [0], [0], [1], [0, 0, 1, 1], [], []>} : vector<8x128xf32>, vector<128x128xf32>, vector<8x128xf32> -> vector<8x128xf32>
    %c0_3 = arith.constant 0 : index
    %c0_4 = arith.constant 0 : index
    %3 = vector.load %arg2[%c0_3, %c0_4] : memref<1x128xf32, #tpu.memory_space<vmem>>, vector<1x128xf32>
    %c0_5 = arith.constant 0 : index
    %c0_6 = arith.constant 0 : index
    %4 = vector.load %arg3[%c0_5, %c0_6] : memref<1x128xf32, #tpu.memory_space<vmem>>, vector<1x128xf32>
    %cst_7 = arith.constant dense<0.000000e+00> : vector<128xf32>
    %5 = vector.multi_reduction <add>, %2, %cst_7 [0] : vector<8x128xf32> to vector<128xf32>
    %6 = vector.shape_cast %5 : vector<128xf32> to vector<1x128xf32>
    %cst_8 = arith.constant 1.250000e-01 : f32
    %7 = vector.broadcast %cst_8 : f32 to vector<1x128xf32>
    %8 = arith.mulf %6, %7 : vector<1x128xf32>
    %9 = vector.broadcast %8 : vector<1x128xf32> to vector<8x128xf32>
    %10 = arith.subf %2, %9 : vector<8x128xf32>
    %11 = arith.mulf %10, %10 : vector<8x128xf32>
    %cst_9 = arith.constant dense<0.000000e+00> : vector<128xf32>
    %12 = vector.multi_reduction <add>, %11, %cst_9 [0] : vector<8x128xf32> to vector<128xf32>
    %13 = vector.shape_cast %12 : vector<128xf32> to vector<1x128xf32>
    %cst_10 = arith.constant 1.250000e-01 : f32
    %14 = vector.broadcast %cst_10 : f32 to vector<1x128xf32>
    %15 = arith.mulf %13, %14 : vector<1x128xf32>
    %cst_11 = arith.constant 9.99999974E-6 : f32
    %16 = vector.broadcast %cst_11 : f32 to vector<1x128xf32>
    %17 = arith.addf %15, %16 : vector<1x128xf32>
    %18 = math.rsqrt %17 : vector<1x128xf32>
    %19 = vector.broadcast %18 : vector<1x128xf32> to vector<8x128xf32>
    %20 = arith.mulf %10, %19 : vector<8x128xf32>
    %21 = vector.broadcast %3 : vector<1x128xf32> to vector<8x128xf32>
    %22 = arith.mulf %20, %21 : vector<8x128xf32>
    %23 = vector.broadcast %4 : vector<1x128xf32> to vector<8x128xf32>
    %24 = arith.addf %22, %23 : vector<8x128xf32>
    %cst_12 = arith.constant 0.000000e+00 : f32
    %25 = vector.broadcast %cst_12 : f32 to vector<8x128xf32>
    %26 = arith.maximumf %24, %25 : vector<8x128xf32>
    %c0_13 = arith.constant 0 : index
    %c0_14 = arith.constant 0 : index
    %27 = vector.load %arg4[%c0_13, %c0_14] : memref<128x128xf32, #tpu.memory_space<vmem>>, vector<128x128xf32>
    %cst_15 = arith.constant dense<0.000000e+00> : vector<8x128xf32>
    %28 = tpu.matmul %26, %27, %cst_15 {dimension_numbers = #tpu.dot_dimension_numbers<[1], [0], [0], [1], [0, 0, 1, 1], [], []>} : vector<8x128xf32>, vector<128x128xf32>, vector<8x128xf32> -> vector<8x128xf32>
    %cst_16 = arith.constant dense<0.000000e+00> : vector<128xf32>
    %29 = vector.multi_reduction <add>, %28, %cst_16 [0] : vector<8x128xf32> to vector<128xf32>
    %30 = vector.shape_cast %29 : vector<128xf32> to vector<1x128xf32>
    %cst_17 = arith.constant 1.250000e-01 : f32
    %31 = vector.broadcast %cst_17 : f32 to vector<1x128xf32>
    %32 = arith.mulf %30, %31 : vector<1x128xf32>
    %33 = vector.broadcast %32 : vector<1x128xf32> to vector<8x128xf32>
    %34 = arith.subf %28, %33 : vector<8x128xf32>
    %35 = arith.mulf %34, %34 : vector<8x128xf32>
    %cst_18 = arith.constant dense<0.000000e+00> : vector<128xf32>
    %36 = vector.multi_reduction <add>, %35, %cst_18 [0] : vector<8x128xf32> to vector<128xf32>
    %37 = vector.shape_cast %36 : vector<128xf32> to vector<1x128xf32>
    %cst_19 = arith.constant 1.250000e-01 : f32
    %38 = vector.broadcast %cst_19 : f32 to vector<1x128xf32>
    %39 = arith.mulf %37, %38 : vector<1x128xf32>
    %cst_20 = arith.constant 9.99999974E-6 : f32
    %40 = vector.broadcast %cst_20 : f32 to vector<1x128xf32>
    %41 = arith.addf %39, %40 : vector<1x128xf32>
    %42 = math.rsqrt %41 : vector<1x128xf32>
    %43 = vector.broadcast %42 : vector<1x128xf32> to vector<8x128xf32>
    %44 = arith.mulf %34, %43 : vector<8x128xf32>
    %c0_21 = arith.constant 0 : index
    %c0_22 = arith.constant 0 : index
    %45 = vector.load %arg5[%c0_21, %c0_22] : memref<8x128xf32, #tpu.memory_space<vmem>>, vector<8x128xf32>
    tpu.vector_store %arg5[%c0_21, %c0_22], %44 {strides = array<i32>} : memref<8x128xf32, #tpu.memory_space<vmem>>, vector<8x128xf32>,
    return
  }
}

</mosaic_0001>

<bundles_post_ra>
// kernel: tpu_custom_call.1
= control target key start
LH: loop header
LB: loop body
LE: loop exit
PB: predicated region body
PF: predicated region fallthrough
CT: control target
= control target key end

     0   :  { %10 = vsyncpa [#allocation3], 0  ;;  %s681_s0 = inlined_call_operand.hbm [shape: f32[8,128], index: 0, kind: input, shape index: {}]   ;;  %s682_s1 = inlined_call_operand.hbm [shape: f32[128,128], index: 1, kind: input, shape index: {}]   ;;  %s683_s2 = inlined_call_operand.vmem [shape: f32[1,128], index: 2, kind: input, shape index: {}]   ;;  %s684_s3 = inlined_call_operand.vmem [shape: f32[1,128], index: 3, kind: input, shape index: {}]   ;;  %s685_s4 = inlined_call_operand.hbm [shape: f32[128,128], index: 4, kind: input, shape index: {}]   ;;  %s686_s5 = inlined_call_operand.hbm [shape: f32[8,128], index: 5, kind: output, shape index: {}]  }
   0x1   :  { %11 = vsyncpa [#allocation6], 0 }
   0x2   :  { %12 = vsyncpa [#allocation4], 0  ;;  %s566_s18 = smov [#allocation5]   ;;  %s472_s22 = scalar_lea.hbm %s682_s1, 2048 }
   0x3   :  { %s28_s19 = sshll.u32 %s566_s18, 4  ;;  %p473_p0 = scmp.ne.s32.totalorder %s682_s1, %s472_s22  ;;  %s29_s19 = int_to_ptr.vmem [resolvable:$true] %s28_s19 }
   0x4   :  { %p476_p1 = scmp.lt.u32.totalorder %s472_s22, %s682_s1 }
   0x6   :  { %p478_p2 = pnand %p476_p1, %p473_p0 }
   0x8   :  { %481 = shalt.err (!%p478_p2)
}
   0x9   :  { %s482_s27 = scalar_lea.vmem %s29_s19, 2048  ;;  %p487_p4 = scmp.lt.s32.totalorder %s29_s19, %s29_s19 }
   0xa   :  { %p483_p3 = scmp.ne.s32.totalorder %s29_s19, %s482_s27  ;;  %p488_p5 = scmp.lt.s32.totalorder %s482_s27, %s482_s27 }
   0xc   :  { %p489_p6 = por %p488_p5, %p487_p4 }
   0xe   :  { %p490_p7 = pnand %p489_p6, %p483_p3 }
  0x10   :  { %493 = shalt.err (!%p490_p7)
}
  0x11   :  { %s567_s28 = smov 128   ;;  %s568_s29 = smov 8  }
  0x12   :  { %34 = dma.hbm_to_vmem [thread:$0]  %s682_s1, 2048, %s29_s19, [#allocation6], %s567_s28, %s567_s28, %s568_s29  }
  0x13   :  { %s569_s7 = smov [#allocation2]   ;;  %s570_s9 = smov [#allocation7]  }
  0x14   :  { %s19_s8 = sshll.u32 %s569_s7, 4  ;;  %s44_s10 = sshll.u32 %s570_s9, 4  ;;  %s20_s8 = int_to_ptr.vmem [resolvable:$true] %s19_s8  ;;  %s45_s10 = int_to_ptr.vmem [resolvable:$true] %s44_s10 }
  0x15   :  { %s494_s13 = scalar_lea.hbm %s681_s0, 128 }
  0x16   :  { %p495_p8 = scmp.ne.s32.totalorder %s681_s0, %s494_s13  ;;  %p498_p9 = scmp.lt.u32.totalorder %s494_s13, %s681_s0 }
  0x18   :  { %p500_p10 = pnand %p498_p9, %p495_p8 }
  0x1a   :  { %503 = shalt.err (!%p500_p10)
}
  0x1b   :  { %s504_s1 = scalar_lea.vmem %s20_s8, 128  ;;  %p509_p12 = scmp.lt.s32.totalorder %s20_s8, %s20_s8 }
  0x1c   :  { %p505_p11 = scmp.ne.s32.totalorder %s20_s8, %s504_s1  ;;  %p510_p13 = scmp.lt.s32.totalorder %s504_s1, %s504_s1 }
  0x1e   :  { %p511_p0 = por %p510_p13, %p509_p12 }
  0x20   :  { %p512_p1 = pnand %p511_p0, %p505_p11 }
  0x22   :  { %515 = shalt.err (!%p512_p1)
}
  0x23   :  { %22 = dma.hbm_to_vmem [thread:$0]  %s681_s0, 128, %s20_s8, [#allocation3]  }
  0x24   :  { %s516_s22 = scalar_lea.hbm %s685_s4, 2048 }
  0x25   :  { %p517_p2 = scmp.ne.s32.totalorder %s685_s4, %s516_s22  ;;  %p520_p3 = scmp.lt.u32.totalorder %s516_s22, %s685_s4 }
  0x27   :  { %p522_p4 = pnand %p520_p3, %p517_p2 }
  0x29   :  { %525 = shalt.err (!%p522_p4)
}
  0x2a   :  { %s526_s27 = scalar_lea.vmem %s45_s10, 2048  ;;  %p531_p6 = scmp.lt.s32.totalorder %s45_s10, %s45_s10 }
  0x2b   :  { %p527_p5 = scmp.ne.s32.totalorder %s45_s10, %s526_s27  ;;  %p532_p7 = scmp.lt.s32.totalorder %s526_s27, %s526_s27 }
  0x2d   :  { %p533_p8 = por %p532_p7, %p531_p6 }
  0x2f   :  { %p534_p9 = pnand %p533_p8, %p527_p5 }
  0x31   :  { %537 = shalt.err (!%p534_p9)
}
  0x32   :  { %50 = dma.hbm_to_vmem [thread:$0]  %s685_s4, 2048, %s45_s10, [#allocation6], %s567_s28, %s567_s28, %s568_s29  }
  0x33   :  { %560 = dma.done.wait [#allocation3], 128  }
  0x34   :  { %561 = vsyncadd [#allocation3], 4294967168 }
  0x35   :  { %562 = dma.done.wait [#allocation6], 4096  }
  0x36   :  { %563 = vsyncadd [#allocation6], 4294963200  ;;  %v571_v0 = vmov 0.0|0.0   ;;  %vm572_vm0 = vmmov 0   ;;  %v573_v1 = vmov 0.0   ;;  %v61_v2 = vld [vmem:[#allocation5] sm:$0xff] }
  0x37   :  { %411 = vmatprep.subr.bf16.mxu0 %v571_v0  ;;  %373 = vmatprep.mubr.msk.f32.mxu0 %vm572_vm0, %v573_v1  ;;  %v62_v3 = vld [vmem:[#allocation5 + $0x8] sm:$0xff]  ;;  %v63_v4 = vld [vmem:[#allocation5 + $0x10] sm:$0xff]  ;;  %v64_v6 = vld [vmem:[#allocation5 + $0x18] sm:$0xff] }
  0x38   :  { %435 = vmatprep.subr.bf16.mxu1 %v571_v0  ;;  %408 = vmatprep.mubr.msk.f32.mxu1 %vm572_vm0, %v573_v1  ;;  %v412_v5 = vpack.c.bf16 %v62_v3, %v61_v2  ;;  %v415_v7 = vpack.c.bf16 %v64_v6, %v63_v4  ;;  %v65_v8 = vld [vmem:[#allocation5 + $0x20] sm:$0xff]  ;;  %v66_v9 = vld [vmem:[#allocation5 + $0x28] sm:$0xff]  ;;  %v67_v11 = vld [vmem:[#allocation5 + $0x30] sm:$0xff] }
  0x39   :  { %v418_v10 = vpack.c.bf16 %v66_v9, %v65_v8  ;;  %v68_v12 = vld [vmem:[#allocation5 + $0x38] sm:$0xff]  ;;  %v69_v14 = vld [vmem:[#allocation5 + $0x40] sm:$0xff]  ;;  %v70_v15 = vld [vmem:[#allocation5 + $0x48] sm:$0xff] }
  0x3a   :  { %413 = vmatpush3.bf16.msra.mxu0 %v412_v5  ;;  %v421_v13 = vpack.c.bf16 %v68_v12, %v67_v11  ;;  %v424_v16 = vpack.c.bf16 %v70_v15, %v69_v14  ;;  %v71_v17 = vld [vmem:[#allocation5 + $0x50] sm:$0xff]  ;;  %v72_v18 = vld [vmem:[#allocation5 + $0x58] sm:$0xff]  ;;  %v73_v20 = vld [vmem:[#allocation5 + $0x60] sm:$0xff] }
  0x3b   :  { %414 = vmatprep.subr.bf16.mxu0 %v571_v0  ;;  %v427_v19 = vpack.c.bf16 %v72_v18, %v71_v17  ;;  %v74_v21 = vld [vmem:[#allocation5 + $0x68] sm:$0xff]  ;;  %v75_v23 = vld [vmem:[#allocation5 + $0x70] sm:$0xff]  ;;  %v76_v24 = vld [vmem:[#allocation5 + $0x78] sm:$0xff] }
  0x3c   :  { %v430_v22 = vpack.c.bf16 %v74_v21, %v73_v20  ;;  %v433_v25 = vpack.c.bf16 %v76_v24, %v75_v23  ;;  %v60_v26 = vld [vmem:[#allocation2] sm:$0xff]  ;;  %v183_v27 = vld [vmem:[#allocation7] sm:$0xff]  ;;  %v184_v28 = vld [vmem:[#allocation7 + $0x8] sm:$0xff] }
  0x3d   :  { %v436_v29 = vpack.c.bf16 %v184_v28, %v183_v27  ;;  %v185_v30 = vld [vmem:[#allocation7 + $0x10] sm:$0xff]  ;;  %v186_v31 = vld [vmem:[#allocation7 + $0x18] sm:$0xff]  ;;  %v187_v33 = vld [vmem:[#allocation7 + $0x20] sm:$0xff] }
  0x3e   :  { %416 = vmatpush3.bf16.msra.mxu0 %v415_v7  ;;  %v439_v32 = vpack.c.bf16 %v186_v31, %v185_v30  ;;  %v188_v34 = vld [vmem:[#allocation7 + $0x28] sm:$0xff]  ;;  %v189_v36 = vld [vmem:[#allocation7 + $0x30] sm:$0xff]  ;;  %v190_v37 = vld [vmem:[#allocation7 + $0x38] sm:$0xff] }
  0x3f   :  { %417 = vmatprep.subr.bf16.mxu0 %v571_v0  ;;  %437 = vmatpush3.bf16.msra.mxu1 %v436_v29  ;;  %v442_v35 = vpack.c.bf16 %v188_v34, %v187_v33  ;;  %v445_v38 = vpack.c.bf16 %v190_v37, %v189_v36  ;;  %v191_v39 = vld [vmem:[#allocation7 + $0x40] sm:$0xff]  ;;  %v192_v40 = vld [vmem:[#allocation7 + $0x48] sm:$0xff]  ;;  %v193_v42 = vld [vmem:[#allocation7 + $0x50] sm:$0xff] }
  0x40   :  { %438 = vmatprep.subr.bf16.mxu1 %v571_v0  ;;  %v448_v41 = vpack.c.bf16 %v192_v40, %v191_v39  ;;  %v194_v43 = vld [vmem:[#allocation7 + $0x58] sm:$0xff]  ;;  %v195_v45 = vld [vmem:[#allocation7 + $0x60] sm:$0xff]  ;;  %v196_v46 = vld [vmem:[#allocation7 + $0x68] sm:$0xff] }
  0x41   :  { %v451_v44 = vpack.c.bf16 %v194_v43, %v193_v42  ;;  %v454_v47 = vpack.c.bf16 %v196_v46, %v195_v45  ;;  %v197_v48 = vld [vmem:[#allocation7 + $0x70] sm:$0xff]  ;;  %v198_v49 = vld [vmem:[#allocation7 + $0x78] sm:$0xff] }
  0x42   :  { %419 = vmatpush3.bf16.msra.mxu0 %v418_v10  ;;  %v457_v50 = vpack.c.bf16 %v198_v49, %v197_v48  ;;  %v305_v7 = vld [vmem:[%s683_s2] ss:$0 sm:$0xff]  ;;  %s574_s2 = smov [#allocation8]  }
  0x43   :  { %420 = vmatprep.subr.bf16.mxu0 %v571_v0  ;;  %440 = vmatpush3.bf16.msra.mxu1 %v439_v32  ;;  %v306_v9 = vld [vmem:[%s684_s3] ss:$0 sm:$0xff]  ;;  %s295_s3 = sshll.u32 %s574_s2, 4  ;;  %s296_s3 = int_to_ptr.vmem [resolvable:$true] %s295_s3 }
  0x44   :  { %441 = vmatprep.subr.bf16.mxu1 %v571_v0  ;;  %s538_s7 = scalar_lea.vmem %s296_s3, 128  ;;  %p543_p11 = scmp.lt.s32.totalorder %s296_s3, %s296_s3 }
  0x45   :  { %p539_p10 = scmp.ne.s32.totalorder %s296_s3, %s538_s7  ;;  %p544_p12 = scmp.lt.s32.totalorder %s538_s7, %s538_s7 }
  0x46   :  { %422 = vmatpush3.bf16.msra.mxu0 %v421_v13 }
  0x47   :  { %423 = vmatprep.subr.bf16.mxu0 %v571_v0  ;;  %443 = vmatpush3.bf16.msra.mxu1 %v442_v35  ;;  %p545_p13 = por %p544_p12, %p543_p11 }
  0x48   :  { %444 = vmatprep.subr.bf16.mxu1 %v571_v0 }
  0x49   :  { %p546_p0 = pnand %p545_p13, %p539_p10 }
  0x4a   :  { %425 = vmatpush3.bf16.msra.mxu0 %v424_v16 }
  0x4b   :  { %426 = vmatprep.subr.bf16.mxu0 %v571_v0  ;;  %446 = vmatpush3.bf16.msra.mxu1 %v445_v38 }
  0x4c   :  { %447 = vmatprep.subr.bf16.mxu1 %v571_v0 }
  0x4e   :  { %428 = vmatpush3.bf16.msra.mxu0 %v427_v19 }
  0x4f   :  { %429 = vmatprep.subr.bf16.mxu0 %v571_v0  ;;  %449 = vmatpush3.bf16.msra.mxu1 %v448_v41 }
  0x50   :  { %450 = vmatprep.subr.bf16.mxu1 %v571_v0 }
  0x52   :  { %431 = vmatpush3.bf16.msra.mxu0 %v430_v22 }
  0x53   :  { %432 = vmatprep.subr.bf16.mxu0 %v571_v0  ;;  %452 = vmatpush3.bf16.msra.mxu1 %v451_v44 }
  0x54   :  { %453 = vmatprep.subr.bf16.mxu1 %v571_v0 }
  0x56   :  { %434 = vmatpush3.bf16.msra.mxu0 %v433_v25 }
  0x57   :  { %455 = vmatpush3.bf16.msra.mxu1 %v454_v47 }
  0x58   :  { %456 = vmatprep.subr.bf16.mxu1 %v571_v0 }
  0x59   :  { %374 = vmatmul.mubr.f32.vlgmr.msra.gmra.mrb[0].mxu0 %v60_v26 }
  0x5b   :  { %458 = vmatpush3.bf16.msra.mxu1 %v457_v50 }
 0x12c   :  { %v143_v51 = vpop.f32.mrb[0].mxu0 }
 0x12d   :  { %v149_v52 = vrot.slane %v143_v51, 4  ;;  %v375_v53 = vpop.f32.mrb[1].mxu0 }
 0x12f   :  { %v150_v54 = vadd.f32 %v149_v52, %v143_v51 }
 0x131   :  { %v151_v55 = vrot.slane %v150_v54, 2 }
 0x133   :  { %v152_v56 = vadd.f32 %v151_v55, %v150_v54 }
 0x135   :  { %v153_v57 = vrot.slane %v152_v56, 1 }
 0x137   :  { %v154_v58 = vadd.f32 %v153_v57, %v152_v56 }
 0x139   :  { %v155_v59 = vmul.f32 0.125, %v154_v58 }
 0x13b   :  { %v156_v60 = vsub.f32 %v143_v51, %v155_v59 }
 0x13d   :  { %v157_v61 = vmul.f32 %v156_v60, %v156_v60 }
 0x13f   :  { %v158_v62 = vrot.slane %v157_v61, 4 }
 0x141   :  { %v159_v63 = vadd.f32 %v158_v62, %v157_v61 }
 0x143   :  { %v160_v1 = vrot.slane %v159_v63, 2 }
 0x145   :  { %v161_v2 = vadd.f32 %v160_v1, %v159_v63 }
 0x147   :  { %v162_v3 = vrot.slane %v161_v2, 1 }
 0x149   :  { %v163_v4 = vadd.f32 %v162_v3, %v161_v2 }
 0x14b   :  { %v164_v5 = vmul.f32 0.125, %v163_v4 }
 0x14d   :  { %v165_v0 = vadd.f32 1e-05, %v164_v5 }
 0x14f   :  { %468 = vrsqrt.f32 %v165_v0 }
 0x159   :  { %v469_v6 = vpop.eup %468 }
 0x15a   :  { %v167_v8 = vmul.f32 %v469_v6, %v156_v60 }
 0x15c   :  { %v174_v10 = vmul.f32 %v305_v7, %v167_v8 }
 0x15e   :  { %v181_v11 = vadd.f32 %v306_v9, %v174_v10 }
 0x160   :  { %v182_v12 = vmax.f32 %v181_v11, 0.0 }
 0x162   :  { %409 = vmatmul.mubr.f32.vlgmr.msra.gmra.mrb[0].mxu1 %v182_v12 }
 0x235   :  { %v265_v13 = vpop.f32.mrb[0].mxu1 }
 0x236   :  { %v269_v14 = vrot.slane %v265_v13, 4  ;;  %v410_v15 = vpop.f32.mrb[1].mxu1 }
 0x238   :  { %v270_v16 = vadd.f32 %v269_v14, %v265_v13 }
 0x23a   :  { %v271_v17 = vrot.slane %v270_v16, 2 }
 0x23c   :  { %v272_v18 = vadd.f32 %v271_v17, %v270_v16 }
 0x23e   :  { %v273_v19 = vrot.slane %v272_v18, 1 }
 0x240   :  { %v274_v20 = vadd.f32 %v273_v19, %v272_v18 }
 0x242   :  { %v275_v21 = vmul.f32 0.125, %v274_v20 }
 0x244   :  { %v276_v22 = vsub.f32 %v265_v13, %v275_v21 }
 0x246   :  { %v277_v23 = vmul.f32 %v276_v22, %v276_v22 }
 0x248   :  { %v278_v24 = vrot.slane %v277_v23, 4 }
 0x24a   :  { %v279_v25 = vadd.f32 %v278_v24, %v277_v23 }
 0x24c   :  { %v280_v26 = vrot.slane %v279_v25, 2 }
 0x24e   :  { %v281_v27 = vadd.f32 %v280_v26, %v279_v25 }
 0x250   :  { %v282_v28 = vrot.slane %v281_v27, 1 }
 0x252   :  { %v283_v29 = vadd.f32 %v282_v28, %v281_v27 }
 0x254   :  { %v284_v30 = vmul.f32 0.125, %v283_v29 }
 0x256   :  { %v285_v31 = vadd.f32 1e-05, %v284_v30 }
 0x258   :  { %470 = vrsqrt.f32 %v285_v31 }
 0x262   :  { %v471_v32 = vpop.eup %470 }
 0x263   :  { %v287_v33 = vmul.f32 %v471_v32, %v276_v22 }
 0x265   :  { %288 = vst [vmem:[#allocation8] sm:$0xff] %v287_v33 }
 0x266   :  { %549 = shalt.err (!%p546_p0)
}
 0x267   :  { %s550_s10 = scalar_lea.hbm %s686_s5, 128 }
 0x268   :  { %p551_p1 = scmp.ne.s32.totalorder %s686_s5, %s550_s10  ;;  %p554_p2 = scmp.lt.u32.totalorder %s550_s10, %s686_s5 }
 0x26a   :  { %p556_p3 = pnand %p554_p2, %p551_p1 }
 0x26c   :  { %559 = shalt.err (!%p556_p3)
}
 0x26d   :  { %298 = dma.vmem_to_hbm [thread:$0]  %s296_s3, 128, %s686_s5, [#allocation4]  }
 0x26e   :  { %564 = dma.done.wait [#allocation4], 128  }
 0x26f   :  { %565 = vsyncadd [#allocation4], 4294967168 }
 0x270   :  { %302 = vsyncpa [#allocation3], 1 }
 0x271   :  { %303 = vsyncpa [#allocation6], 1 }
 0x272   :  { %304 = vsyncpa [#allocation4], 1 }

</bundles_post_ra>
